<compile_context>
chip_gen: v5e
topology: v5e:2x2
jax: 0.10.0
libtpu: 0.0.40
codegen_flags: <defaults>
</compile_context>

<pallas_src>
import functools

import jax
import jax.numpy as jnp
from jax.experimental import pallas as pl
from jax.experimental.pallas import tpu as pltpu


def _layernorm2d_kernel(x_ref, w_ref, b_ref, o_ref, *, eps):
    # x_ref: (Bb, C, T) block; w_ref/b_ref: (C, 1). Reduce over channels (axis=1).
    x = x_ref[...].astype(jnp.float32)
    u = jnp.mean(x, axis=1, keepdims=True)               # per-pixel mean over C
    d = x - u
    s = jnp.mean(d * d, axis=1, keepdims=True)           # biased variance
    inv = jax.lax.rsqrt(s + eps)                          # EUP slot, ~free
    w = w_ref[...].astype(jnp.float32)[None, :, :]        # (1, C, 1)
    b = b_ref[...].astype(jnp.float32)[None, :, :]
    o_ref[...] = (d * inv * w + b).astype(o_ref.dtype)


def _divisors(n):
    out = set()
    i = 1
    while i * i <= n:
        if n % i == 0:
            out.add(i)
            out.add(n // i)
        i += 1
    return sorted(out)


def _choose_tiling(B, C, hw_pad, itemsize):
    """Pick (Bb, T, vmem_limit_bytes) from the per-generation VMEM budget."""
    try:
        info = pltpu.get_tpu_info()
        vmem_bytes = int(getattr(info, "vmem_capacity_bytes", 64 * 1024 * 1024))
    except Exception:
        vmem_bytes = 64 * 1024 * 1024  # conservative: v7x physical VMEM per TC

    # Headroom: double-buffered in + out blocks and f32 temporaries must fit
    # comfortably below physical VMEM (especially on v7x's 64 MiB).
    budget = int(vmem_bytes * 0.40)

    def footprint(bb, t):
        blk = bb * C * t
        # 2x double-buffered input + 2x double-buffered output (x dtype)
        # + ~3 f32-sized live temporaries inside the kernel body.
        return 4 * blk * itemsize + 3 * blk * 4

    n_lanes = hw_pad // 128
    t_cands = sorted((128 * k for k in _divisors(n_lanes)), reverse=True)
    T = 128
    for t in t_cands:
        if footprint(1, t) <= budget:
            T = t
            break

    b_cands = sorted(_divisors(B), reverse=True)
    Bb = 1
    for bb in b_cands:
        if footprint(bb, T) <= budget:
            Bb = bb
            break

    # v7x has 2 TensorCores per chip: keep >= 2 grid steps if the problem
    # has at least 2 minimal blocks, so the second core isn't idle.
    def steps(bb, t):
        return (B // bb) * (hw_pad // t)

    if steps(Bb, T) < 2 and B * n_lanes >= 2:
        fixed = False
        for bb in b_cands:
            if footprint(bb, T) <= budget and steps(bb, T) >= 2:
                Bb = bb
                fixed = True
                break
        if not fixed:
            for t in t_cands:
                if footprint(Bb, t) <= budget and steps(Bb, t) >= 2:
                    T = t
                    break

    vmem_limit = min(int(vmem_bytes * 0.70), 100 * 1024 * 1024)
    vmem_limit = max(vmem_limit, footprint(Bb, T) + (4 << 20))
    return Bb, T, vmem_limit


def layernorm2d(x, weight, bias, *, eps=1e-6):
    """LayerNorm2d forward. x: (B, C, H, W) NCHW; weight/bias: (C,)."""
    B, C, H, W = x.shape
    HW = H * W
    hw_pad = ((HW + 127) // 128) * 128  # lane-tile sizing reference only

    x_flat = x.reshape(B, C, HW)        # contiguous trailing dims -> free reshape
    w2 = weight.reshape(C, 1)
    b2 = bias.reshape(C, 1)

    Bb, T, vmem_limit = _choose_tiling(B, C, hw_pad, jnp.dtype(x.dtype).itemsize)
    # T is a multiple of 128 dividing hw_pad, so hw_pad // T == cdiv(HW, T);
    # the ragged last lane-block (if any) is masked by Pallas on store and the
    # garbage lanes never mix into valid columns (reduction is over C only).
    grid = (B // Bb, hw_pad // T)

    kernel = functools.partial(_layernorm2d_kernel, eps=eps)
    out_flat = pl.pallas_call(
        kernel,
        out_shape=jax.ShapeDtypeStruct((B, C, HW), x.dtype),
        grid_spec=pltpu.PrefetchScalarGridSpec(
            num_scalar_prefetch=0,
            grid=grid,
            in_specs=[
                pl.BlockSpec((Bb, C, T), lambda b, t: (b, 0, t)),
                pl.BlockSpec((C, 1), lambda b, t: (0, 0)),
                pl.BlockSpec((C, 1), lambda b, t: (0, 0)),
            ],
            out_specs=pl.BlockSpec((Bb, C, T), lambda b, t: (b, 0, t)),
        ),
        compiler_params=pltpu.CompilerParams(
            dimension_semantics=("parallel", "parallel"),
            vmem_limit_bytes=vmem_limit,
        ),
    )(x_flat, w2, b2)

    return out_flat.reshape(B, C, H, W)


def layernorm2d_ref(x, weight, bias, eps=1e-6):
    u = jnp.mean(x, axis=1, keepdims=True)
    s = jnp.mean((x - u) ** 2, axis=1, keepdims=True)
    y = (x - u) / jnp.sqrt(s + eps)
    return weight[None, :, None, None] * y + bias[None, :, None, None]


if __name__ == "__main__":
    key = jax.random.PRNGKey(0)
    B, C, H, W = 2, 4, 16, 16
    x = jax.random.normal(key, (B, C, H, W), dtype=jnp.float32)

    # Deterministic parameter init matching nn.Parameter(torch.ones/zeros(C)).
    weight = jnp.ones((C,), dtype=jnp.float32)
    bias = jnp.zeros((C,), dtype=jnp.float32)

    out = layernorm2d(x, weight, bias, eps=1e-6)
    out = jax.block_until_ready(out)

    ref = layernorm2d_ref(x, weight, bias, eps=1e-6)
    assert out.shape == (B, C, H, W)
    assert jnp.allclose(out, ref, atol=1e-5, rtol=1e-5)
    print("KERNEL_OK")
</pallas_src>

<mosaic_0001>
module attributes {stable_mosaic.version = 11 : i64} {
  func.func @_layernorm2d_kernel(%arg0: i32, %arg1: i32, %arg2: memref<1x4x256xf32, #tpu.memory_space<vmem>>, %arg3: memref<4x1xf32, #tpu.memory_space<vmem>>, %arg4: memref<4x1xf32, #tpu.memory_space<vmem>>, %arg5: memref<1x4x256xf32, #tpu.memory_space<vmem>>) attributes {dimension_semantics = [#tpu.dimension_semantics<parallel>, #tpu.dimension_semantics<parallel>], iteration_bounds = array<i64: 2, 1>, scalar_prefetch = 0 : i64, scratch_operands = 0 : i64, tpu.core_type = #tpu.core_type<tc>, window_params = [{transform_indices = @transform_0, window_bounds = array<i64: 1, 4, 256>}, {pipeline_mode = #tpu.pipeline_mode<synchronous>, transform_indices = @transform_1, window_bounds = array<i64: 4, 1>}, {pipeline_mode = #tpu.pipeline_mode<synchronous>, transform_indices = @transform_2, window_bounds = array<i64: 4, 1>}, {transform_indices = @transform_3, window_bounds = array<i64: 1, 4, 256>}]} {
    %c0 = arith.constant 0 : index
    %c0_0 = arith.constant 0 : index
    %c0_1 = arith.constant 0 : index
    %0 = vector.load %arg2[%c0, %c0_0, %c0_1] : memref<1x4x256xf32, #tpu.memory_space<vmem>>, vector<1x4x256xf32>
    %cst = arith.constant dense<0.000000e+00> : vector<1x256xf32>
    %1 = vector.multi_reduction <add>, %0, %cst [1] : vector<1x4x256xf32> to vector<1x256xf32>
    %2 = vector.shape_cast %1 : vector<1x256xf32> to vector<1x1x256xf32>
    %cst_2 = arith.constant 4.000000e+00 : f32
    %3 = vector.broadcast %cst_2 : f32 to vector<1x1x256xf32>
    %4 = arith.divf %2, %3 : vector<1x1x256xf32>
    %5 = vector.broadcast %4 : vector<1x1x256xf32> to vector<1x4x256xf32>
    %6 = arith.subf %0, %5 : vector<1x4x256xf32>
    %7 = arith.mulf %6, %6 : vector<1x4x256xf32>
    %cst_3 = arith.constant dense<0.000000e+00> : vector<1x256xf32>
    %8 = vector.multi_reduction <add>, %7, %cst_3 [1] : vector<1x4x256xf32> to vector<1x256xf32>
    %9 = vector.shape_cast %8 : vector<1x256xf32> to vector<1x1x256xf32>
    %cst_4 = arith.constant 4.000000e+00 : f32
    %10 = vector.broadcast %cst_4 : f32 to vector<1x1x256xf32>
    %11 = arith.divf %9, %10 : vector<1x1x256xf32>
    %cst_5 = arith.constant 9.99999997E-7 : f32
    %12 = vector.broadcast %cst_5 : f32 to vector<1x1x256xf32>
    %13 = arith.addf %11, %12 : vector<1x1x256xf32>
    %14 = math.rsqrt %13 : vector<1x1x256xf32>
    %c0_6 = arith.constant 0 : index
    %c0_7 = arith.constant 0 : index
    %15 = vector.load %arg3[%c0_6, %c0_7] : memref<4x1xf32, #tpu.memory_space<vmem>>, vector<4x1xf32>
    %16 = vector.shape_cast %15 : vector<4x1xf32> to vector<1x4x1xf32>
    %c0_8 = arith.constant 0 : index
    %c0_9 = arith.constant 0 : index
    %17 = vector.load %arg4[%c0_8, %c0_9] : memref<4x1xf32, #tpu.memory_space<vmem>>, vector<4x1xf32>
    %18 = vector.shape_cast %17 : vector<4x1xf32> to vector<1x4x1xf32>
    %19 = vector.broadcast %14 : vector<1x1x256xf32> to vector<1x4x256xf32>
    %20 = arith.mulf %6, %19 : vector<1x4x256xf32>
    %21 = vector.broadcast %16 : vector<1x4x1xf32> to vector<1x4x256xf32>
    %22 = arith.mulf %20, %21 : vector<1x4x256xf32>
    %23 = vector.broadcast %18 : vector<1x4x1xf32> to vector<1x4x256xf32>
    %24 = arith.addf %22, %23 : vector<1x4x256xf32>
    %c0_10 = arith.constant 0 : index
    %c0_11 = arith.constant 0 : index
    %c0_12 = arith.constant 0 : index
    %25 = vector.load %arg5[%c0_10, %c0_11, %c0_12] : memref<1x4x256xf32, #tpu.memory_space<vmem>>, vector<1x4x256xf32>
    tpu.vector_store %arg5[%c0_10, %c0_11, %c0_12], %24 {strides = array<i32>} : memref<1x4x256xf32, #tpu.memory_space<vmem>>, vector<1x4x256xf32>,
    return
  }
  func.func @transform_0(%arg0: i32, %arg1: i32) -> (i32, i32, i32) {
    %c0_i32 = arith.constant 0 : i32
    %c0_i32_0 = arith.constant 0 : i32
    return %arg0, %c0_i32, %arg1 : i32, i32, i32
  }
  func.func @transform_1(%arg0: i32, %arg1: i32) -> (i32, i32) {
    %c0_i32 = arith.constant 0 : i32
    %c0_i32_0 = arith.constant 0 : i32
    %c0_i32_1 = arith.constant 0 : i32
    return %c0_i32, %c0_i32_0 : i32, i32
  }
  func.func @transform_2(%arg0: i32, %arg1: i32) -> (i32, i32) {
    %c0_i32 = arith.constant 0 : i32
    %c0_i32_0 = arith.constant 0 : i32
    %c0_i32_1 = arith.constant 0 : i32
    return %c0_i32, %c0_i32_0 : i32, i32
  }
  func.func @transform_3(%arg0: i32, %arg1: i32) -> (i32, i32, i32) {
    %c0_i32 = arith.constant 0 : i32
    %c0_i32_0 = arith.constant 0 : i32
    return %arg0, %c0_i32, %arg1 : i32, i32, i32
  }
}

</mosaic_0001>

<bundles_post_ra>
// kernel: tpu_custom_call.1
= control target key start
LH: loop header
LB: loop body
LE: loop exit
PB: predicated region body
PF: predicated region fallthrough
CT: control target
= control target key end

     0   :  { %8 = vsyncpa [#allocation3], 0  ;;  %s785_s0 = inlined_call_operand.hbm [shape: f32[2,4,256], index: 0, kind: input, shape index: {}]   ;;  %s786_s1 = inlined_call_operand.vmem [shape: f32[4,1], index: 1, kind: input, shape index: {}]   ;;  %s787_s2 = inlined_call_operand.vmem [shape: f32[4,1], index: 2, kind: input, shape index: {}]   ;;  %s788_s3 = inlined_call_operand.hbm [shape: f32[2,4,256], index: 3, kind: output, shape index: {}]  }
   0x1   :  { %10 = vsyncpa [#allocation3 + $0x1], 0 }
   0x2   :  { %11 = vsyncpa [#allocation4], 0 }
   0x3   :  { %13 = vsyncpa [#allocation4 + $0x1], 0  ;;  %s649_s12 = smov 0   ;;  %s651_s13 = smov 0  }
   0x4   :  { %s653_s14 = smov 0   ;;  %s655_s15 = smov 0  }
   0x5   :  { %s657_s16 = smov 0   ;;  %s659_s17 = smov 0  }
   0x6 LB: > { %s423_s18 = sadd.s32 4294967295, %s624_s17   ;;  %s424_s19 = sadd.s32 4294967294, %s624_s17   ;;  %s624_s17 = sphi %s659_s17, %s19_s17   ;;  %s620_s16 = sphi %s657_s16, %s797_s16   ;;  %s616_s15 = sphi %s655_s15, %s796_s15   ;;  %s612_s14 = sphi %s653_s14, %s795_s14   ;;  %s608_s13 = sphi %s651_s13, %s794_s13   ;;  %s604_s12 = sphi %s649_s12, %s793_s12  }
   0x7   : > { %s31_s20 = sadd.s32 1, %s620_s16  ;;  %s40_s21 = sadd.s32 1, %s612_s14 }
   0x8   : > { %p33_p0 = scmp.ge.s32.totalorder %s31_s20, 2  ;;  %p47_p1 = scmp.ne.s32.totalorder %s612_s14, %s608_s13 }
   0x9   : > { %p48_p2 = scmp.eq.s32.totalorder %s624_s17, 0  ;;  %p53_p3 = scmp.ne.s32.totalorder %s608_s13, %s604_s12 }
   0xa   : > { %s799_s20 = smov (%p33_p0, %s31_s20), 0  ;;  %p54_p5 = scmp.eq.s32.totalorder %s423_s18, 0 }
   0xb   : > { %p690_p4 = por %p48_p2, %p47_p1  ;;  %s35_s23 = ssub.s32 %s620_s16, %s799_s20 }
   0xc   : > { %p121_p6 = scmp.eq.s32.totalorder %s423_s18, 1  ;;  %p38_p7 = scmp.eq.s32.totalorder %s35_s23, 0 }
   0xd   : > { %p696_p8 = por %p54_p5, %p53_p3  ;;  %p127_p10 = scmp.eq.s32.totalorder %s424_s19, 1 }
   0xe   : > { %p700_p9 = por %p121_p6, %p47_p1  ;;  %p426_p12 = scmp.ge.s32.totalorder %s624_s17, 2 }
   0xf   : > { %s705_s26 = scalar_select %p38_p7, %s612_s14, %s40_s21  }
  0x10   : > { %p707_p11 = por %p127_p10, %p53_p3  ;;  %p452_p13 = scmp.lt.s32.totalorder %s624_s17, 2 }
  0x11   : > { %s153_s28 = sand.u32 1, %s612_s14   ;;  %s438_s30 = sshll.u32 %s620_s16, 3 }
  0x12   : > { %s427_s29 = sshll.u32 %s153_s28, 3  ;;  %s164_s6 = scalar_lea.hbm %s785_s0, %s438_s30 }
  0x13   : > { %s157_s7 = scalar_lea.vmem [#allocation2], %s427_s29  ;;  %s166_s9 = sshll.u32 %s164_s6, 4  ;;  %s167_s9 = int_to_ptr.hbm [resolvable:$true] %s166_s9 }
  0x14   : > { %s168_s8 = sshll.u32 %s157_s7, 4  ;;  %p445_p0 = pnand %p452_p13, %p690_p4  ;;  %s169_s8 = int_to_ptr.vmem [resolvable:$true] %s168_s8 }
  0x15   : > { %p430_p1 = scmp.ge.s32.totalorder %s624_s17, 1  ;;  %p173_p2 = scmp.lt.s32.totalorder %s624_s17, 3 }
  0x16   : > { %s154_s10 = scalar_lea.sflag [#allocation3], %s153_s28 }
  0x17   : > { %447 = dma.hbm_to_vmem [thread:$0]  (!%p445_p0), %s167_s9, 128, %s169_s8, %s154_s10  }
  0x18   : > { %p174_p3 = pnand %p430_p1, %p173_p2 }
  0x19   : > { %s723_s11 = sand.u32 (!%p174_p3), 1, %s608_s13  }
  0x1a   : > { %177 = sbr.rel (%p174_p3) target bundleno = 164 (0xa4), region = 32  ;;  %s431_s18 = sshll.u32 (!%p174_p3), %s723_s11, 3 }
  0x1b   : > { %s180_s19 = scalar_lea.sflag (!%p174_p3), [#allocation3], %s723_s11  ;;  %s183_s21 = scalar_lea.vmem (!%p174_p3), [#allocation2], %s431_s18 }
  0x1f   : > { %595 = dma.done.wait (%p696_p8), %s180_s19, 128  }
  0x20   : > { %597 = vsyncadd (%p696_p8), %s180_s19, 4294967168  ;;  %v626_v0 = vmov 0   ;;  %v291_v1 = vld [vmem:[%s786_s1] sm:$0xf]  ;;  %v627_v2 = vmov 4.0   ;;  %v209_v5 = vld [vmem:[%s183_s21] sm:$0xff] }
  0x21   : > { %505 = vset.pattern.permute.xlu0 %v626_v0  ;;  %506 = vrcp.f32 %v627_v2  ;;  %v292_v3 = vld [vmem:[%s787_s2] sm:$0xf]  ;;  %211 = vst [vmem:[#allocation1] ss:$2 sm:$0xff] %v209_v5  ;;  %vm216_vm0 = vcmask 1043456   ;;  %s439_s24 = sshll.u32 %s616_s15, 3 }
  0x22   : > { %301 = vperm.xlu0 %505, %v291_v1   ;;  %s334_s5 = scalar_lea.hbm %s788_s3, %s439_s24  ;;  %s206_s6 = scalar_lea.vmem [#allocation5], %s431_s18 }
  0x23   : > { %s336_s7 = sshll.u32 %s206_s6, 4  ;;  %s338_s8 = sshll.u32 %s334_s5, 4  ;;  %s337_s7 = int_to_ptr.vmem [resolvable:$true] %s336_s7  ;;  %s339_s8 = int_to_ptr.hbm [resolvable:$true] %s338_s8 }
  0x24   : > { %s321_s9 = scalar_lea.sflag [#allocation4], %s723_s11  ;;  %s556_s10 = sshra.s32 %s339_s8, 4  ;;  %s557_s10 = int_to_ptr.hbm [resolvable:$true] %s556_s10 }
  0x25   : > { %s558_s15 = scalar_lea.hbm %s557_s10, 8  ;;  %s562_s18 = scalar_lea.hbm %s788_s3, 16 }
  0x26   : > { %p559_p4 = scmp.ne.s32.totalorder %s557_s10, %s558_s15  ;;  %p563_p7 = scmp.lt.s32.totalorder %s557_s10, %s788_s3 }
  0x27   : > { %v507_v4 = vpop.eup %506  ;;  %p564_p8 = scmp.lt.s32.totalorder %s562_s18, %s558_s15 }
  0x28   : > { %v232_v6 = vmul.f32 4.0, %v507_v4  ;;  %v213_v8 = vld.sshfl [vmem:[#allocation1 + $0x8] sm:$0xff pattern:$0x75316420]  ;;  %vm236_vm1 = vweird.f32 %v507_v4  ;;  %p560_p5 = pnand %p559_p4, %p700_p9 }
  0x29   : > { %v224_v9 = vsel %vm216_vm0, %v213_v8, 0.0  ;;  %v212_v10 = vld.sshfl [vmem:[#allocation1] sm:$0xff pattern:$0x75316420]  ;;  %p565_p10 = por %p564_p8, %p563_p7 }
  0x2a   : > { %311 = vperm.xlu0 %505, %v292_v3   ;;  %v233_v7 = vsub.f32 1.0, %v232_v6  ;;  %v225_v11 = vrot.slane %v224_v9, 4  ;;  %v217_v13 = vsel %vm216_vm0, %v212_v10, 0.0  ;;  %v628_v6 = vmov 839922192   ;;  %p561_p6 = pneg %p560_p5 }
  0x2b   : > { %v218_v14 = vrot.slane %v217_v13, 4 }
  0x2c   : > { %v234_v12 = vmul.f32 %v507_v4, %v233_v7  ;;  %v226_v15 = vadd.f32 %v225_v11, %v224_v9  ;;  %v304_v7 = vunpack.c.l.s4 %v628_v6  ;;  %p566_p13 = pnand %p565_p10, %p561_p6 }
  0x2d   : > { %v219_v16 = vadd.f32 %v218_v14, %v217_v13 }
  0x2e   : > { %v227_v17 = vrot.slane %v226_v15, 2  ;;  %v235_v18 = vadd.f32 %v507_v4, %v234_v12  ;;  %v305_v9 = vunpack.c.0.s8 %v304_v7 }
  0x2f   : > { %v220_v19 = vrot.slane %v219_v16, 2 }
  0x30   : > { %v228_v20 = vadd.f32 %v227_v17, %v226_v15  ;;  %v237_v23 = vsel %vm236_vm1, %v507_v4, %v235_v18 }
  0x31   : > { %v221_v21 = vadd.f32 %v220_v19, %v219_v16 }
  0x32   : > { %v229_v22 = vrot.slane %v228_v20, 1 }
  0x33   : > { %v222_v24 = vrot.slane %v221_v21, 1 }
  0x34   : > { %v230_v25 = vadd.f32 %v229_v22, %v228_v20 }
  0x35   : > { %v223_v26 = vadd.f32 %v222_v24, %v221_v21 }
  0x36   : > { %v239_v27 = vmul.f32 %v237_v23, %v230_v25 }
  0x37   : > { %v238_v28 = vmul.f32 %v237_v23, %v223_v26 }
  0x38   : > { %v242_v29 = vrot.slane %v239_v27, 4 }
  0x3a   : > { %v243_v30 = vsel %vm216_vm0, %v238_v28, %v242_v29 }
  0x3b   : > { %v245_v31 = vsub.f32 %v209_v5, %v243_v30 }
  0x3d   : > { %v246_v32 = vmul.f32 %v245_v31, %v245_v31 }
  0x3f   : > { %248 = vst [vmem:[#allocation1] ss:$2 sm:$0xff] %v246_v32 }
  0x46   : > { %v250_v33 = vld.sshfl [vmem:[#allocation1 + $0x8] sm:$0xff pattern:$0x75316420]  ;;  %v249_v35 = vld.sshfl [vmem:[#allocation1] sm:$0xff pattern:$0x75316420] }
  0x47   : > { %v260_v34 = vsel %vm216_vm0, %v250_v33, 0.0  ;;  %v253_v37 = vsel %vm216_vm0, %v249_v35, 0.0 }
  0x48   : > { %v261_v36 = vrot.slane %v260_v34, 4  ;;  %v254_v38 = vrot.slane %v253_v37, 4 }
  0x4a   : > { %v262_v39 = vadd.f32 %v261_v36, %v260_v34  ;;  %v255_v40 = vadd.f32 %v254_v38, %v253_v37 }
  0x4c   : > { %v263_v41 = vrot.slane %v262_v39, 2  ;;  %v256_v42 = vrot.slane %v255_v40, 2 }
  0x4e   : > { %v264_v43 = vadd.f32 %v263_v41, %v262_v39  ;;  %v257_v44 = vadd.f32 %v256_v42, %v255_v40 }
  0x50   : > { %v265_v45 = vrot.slane %v264_v43, 1  ;;  %v258_v46 = vrot.slane %v257_v44, 1 }
  0x52   : > { %v266_v47 = vadd.f32 %v265_v45, %v264_v43  ;;  %v259_v48 = vadd.f32 %v258_v46, %v257_v44 }
  0x54   : > { %v268_v49 = vmul.f32 %v266_v47, %v237_v23  ;;  %v267_v50 = vmul.f32 %v259_v48, %v237_v23 }
  0x56   : > { %v270_v51 = vadd.f32 1e-06, %v268_v49  ;;  %v269_v52 = vadd.f32 1e-06, %v267_v50 }
  0x58   : > { %508 = vrsqrt.f32 %v270_v51  ;;  %vm287_vm2 = vweird.f32 %v270_v51  ;;  %vm277_vm5 = vweird.f32 %v269_v52 }
  0x59   : > { %510 = vrsqrt.f32 %v269_v52 }
  0x5e   : > { %v509_v53 = vpop.eup %508 }
  0x5f   : > { %v282_v54 = vmul.f32 %v509_v53, %v270_v51  ;;  %v511_v55 = vpop.eup %510  ;;  %vm288_vm3 = vweird.f32 %v509_v53 }
  0x60   : > { %v272_v56 = vmul.f32 %v511_v55, %v269_v52  ;;  %vm289_vm4 = vmor %vm287_vm2, %vm288_vm3  ;;  %vm278_vm6 = vweird.f32 %v511_v55 }
  0x61   : > { %v283_v57 = vmul.f32 %v509_v53, %v282_v54  ;;  %vm279_vm7 = vmor %vm277_vm5, %vm278_vm6 }
  0x62   : > { %v273_v58 = vmul.f32 %v511_v55, %v272_v56 }
  0x63   : > { %v284_v59 = vmul.f32 0.5, %v283_v57 }
  0x64   : > { %v274_v60 = vmul.f32 0.5, %v273_v58 }
  0x65   : > { %v285_v61 = vsub.f32 1.5, %v284_v59 }
  0x66   : > { %v275_v62 = vsub.f32 1.5, %v274_v60 }
  0x67   : > { %v286_v63 = vmul.f32 %v509_v53, %v285_v61 }
  0x68   : > { %v276_v0 = vmul.f32 %v511_v55, %v275_v62 }
  0x69   : > { %v290_v1 = vsel %vm289_vm4, %v509_v53, %v286_v63 }
  0x6a   : > { %v295_v2 = vrot.slane %v290_v1, 4  ;;  %v280_v3 = vsel %vm279_vm7, %v511_v55, %v276_v0 }
  0x6c   : > { %v296_v4 = vsel %vm216_vm0, %v280_v3, %v295_v2 }
  0x6d   : > { %v298_v5 = vmul.f32 %v296_v4, %v245_v31 }
  0x94   : > { %v302_v8 = vpop.permute.xlu0 %301 }
  0x95   : > { %v306_v10 = vperm.slane %v302_v8, %v305_v9 }
  0x97   : > { %v308_v12 = vmul.f32 %v306_v10, %v298_v5 }
  0x9c   : > { %v312_v11 = vpop.permute.xlu0 %311 }
  0x9d   : > { %v316_v13 = vperm.slane %v312_v11, %v305_v9 }
  0x9f   : > { %v318_v14 = vadd.f32 %v316_v13, %v308_v12 }
  0xa1   : > { %319 = vst [vmem:[%s206_s6] sm:$0xff] %v318_v14 }
  0xa2   : > { %569 = shalt.err (!%p566_p13)
}
  0xa3   : > { %442 = dma.vmem_to_hbm [thread:$0]  (%p700_p9), %s337_s7, 128, %s339_s8, %s321_s9  }
  0xa4 PF: > { %s350_s11 = sand.u32 1, %s604_s12   ;;  %p449_p0 = pnand %p426_p12, %p707_p11 }
  0xa5   : > { %s351_s28 = scalar_lea.sflag [#allocation4], %s350_s11 }
  0xa6   : > { %p450_p1 = pneg %p449_p0 }
  0xa8   : > { %599 = dma.done.wait (%p450_p1), %s351_s28, 128  }
  0xa9   : > { %601 = vsyncadd (%p450_p1), %s351_s28, 4294967168  ;;  %s19_s17 = sadd.s32 1, %s624_s17   ;;  %s793_s12 = smov %s608_s13 }
  0xaa   : > { %p16_p2 = scmp.ge.s32.totalorder %s19_s17, 4   ;;  %s794_s13 = smov %s612_s14 }
  0xab   : > { %s795_s14 = smov %s705_s26  ;;  %s796_s15 = smov %s620_s16 }
  0xac   : > { %s797_s16 = smov %s799_s20  ;;  %18 = sbr.rel (!%p16_p2) target bundleno = 6 (0x6), region = 77 }
  0xb1   :  { %357 = vsyncpa [#allocation3], 1 }
  0xb2   :  { %359 = vsyncpa [#allocation3 + $0x1], 1 }
  0xb3   :  { %360 = vsyncpa [#allocation4], 1 }
  0xb4   :  { %362 = vsyncpa [#allocation4 + $0x1], 1 }

</bundles_post_ra>
